<compile_context>
chip_gen: v6e
topology: v6e:2x2x1
jax: 0.10.0
libtpu: 0.0.40
codegen_flags: <defaults>
</compile_context>

<pallas_src>
import functools
import math

import jax
import jax.numpy as jnp
from jax.experimental import pallas as pl
from jax.experimental.pallas import tpu as pltpu


# ---------------------------------------------------------------------------
# helpers
# ---------------------------------------------------------------------------
def _round_up(x, m):
    return (x + m - 1) // m * m


def _pad2(a, rows, cols):
    pr, pc = rows - a.shape[0], cols - a.shape[1]
    if pr or pc:
        a = jnp.pad(a, ((0, pr), (0, pc)))
    return a


def _vmem_budget_bytes():
    """Generation-aware scoped-VMEM budget (v7x: 64 MiB physical; v5e/v6e: 128 MiB)."""
    cap = None
    try:
        cap = pltpu.get_tpu_info().vmem_capacity_bytes
    except Exception:
        cap = None
    if cap is None:
        cap = 128 * 1024 * 1024
    if cap <= 64 * 1024 * 1024:            # v7x-class TensorCore
        return 48 * 1024 * 1024
    return 100 * 1024 * 1024               # v5e / v6e


_HAS_BUFFERED = hasattr(pl, "Buffered")


def _spec(shape, index_map, buffers=None):
    """BlockSpec with optional explicit buffer count (falls back if unsupported)."""
    if buffers is None or not _HAS_BUFFERED:
        return pl.BlockSpec(shape, index_map)
    try:
        return pl.BlockSpec(shape, index_map, pipeline_mode=pl.Buffered(buffers))
    except TypeError:
        return pl.BlockSpec(shape, index_map)


# ---------------------------------------------------------------------------
# tile selection (VMEM-footprint driven)
# ---------------------------------------------------------------------------
_WLM_BUFFERS_MAX = 3   # deep prefetch for W_lm vocab tiles


def _policy_vmem_bytes(tm, tn, h_pad, wlm_bufs):
    return (2 * tm * h_pad * 2                      # activations, double-buffered bf16
            + 2 * h_pad * h_pad * 2                 # W1 + W2, single-buffered bf16
            + 2 * h_pad * 4                         # b1 + b2, f32
            + wlm_bufs * (h_pad * tn * 2 + tn * 4)  # W_lm + b_lm tiles
            + 2 * tm * tn * 4                       # f32 logits out, double-buffered
            + tm * h_pad * 2)                       # resident hidden scratch bf16


def _value_vmem_bytes(tm, h_pad):
    return (2 * tm * h_pad * 2 + 2 * h_pad * h_pad * 2 + 2 * h_pad * 4
            + h_pad * 128 * 2 + 2 * tm * 128 * 4)


def _select_policy_tiles(h_pad, v_pad128, budget):
    # Prefer a large row tile first (halves W_lm HBM re-streams), then vocab tile.
    for tm in (512, 256, 128):
        for tn in (1024, 512, 256, 128):
            tn_eff = min(tn, v_pad128)
            if _policy_vmem_bytes(tm, tn_eff, h_pad, _WLM_BUFFERS_MAX) <= 0.8 * budget:
                return tm, tn_eff
    return 128, min(128, v_pad128)


def _select_value_tile(h_pad, budget):
    for tm in (1024, 512, 256, 128):
        if _value_vmem_bytes(tm, h_pad) <= 0.8 * budget:
            return tm
    return 128


def _row_tile(target_tm, n):
    """Row tile for this call: clamp to the problem size, but keep >=2 row tiles
    when there is enough work so both v7x megacore TensorCores get rows."""
    tm = min(target_tm, _round_up(n, 8))
    if n >= 256 and _round_up(n, tm) // tm < 2:
        tm = max(128, _round_up(_round_up(n, 16) // 2, 8))
    return tm


# ---------------------------------------------------------------------------
# Kernels
# ---------------------------------------------------------------------------
def _policy_fused_kernel(x_ref, w1_ref, b1_ref, w2_ref, b2_ref,
                         wlm_ref, blm_ref, o_ref, h_ref):
    """Fused policy backbone + LM head.

    grid = (row_tiles, vocab_tiles).  At j == 0 the backbone hidden state for
    the current row tile is computed once (MXU bf16, f32 accumulation, tanh on
    the EUP) and parked in a bf16 VMEM scratch; every vocab tile j then
    contracts that resident hidden tile against a (H, tn) slice of W_lm.
    policy_hidden never touches HBM.

    NOTE: this scratch-reuse pattern is only valid because the vocab axis is
    the innermost, sequential ("arbitrary") grid axis.  Do not reorder the grid
    or mark axis 1 parallel.
    """
    j = pl.program_id(1)

    @pl.when(j == 0)
    def _():
        x = x_ref[...]                                                 # bf16 (tm, H)
        h1 = jnp.tanh(
            jnp.dot(x, w1_ref[...], preferred_element_type=jnp.float32)
            + b1_ref[...])                                             # f32
        h2 = (jnp.dot(h1.astype(w2_ref.dtype), w2_ref[...],
                      preferred_element_type=jnp.float32)
              + b2_ref[...])                                           # f32
        h_ref[...] = h2.astype(h_ref.dtype)                            # bf16 scratch

    o_ref[...] = (
        jnp.dot(h_ref[...], wlm_ref[...], preferred_element_type=jnp.float32)
        + blm_ref[...]
    ).astype(o_ref.dtype)


def _value_fused_kernel(x_ref, w1_ref, b1_ref, w2_ref, b2_ref, ws_ref, o_ref):
    """Fused critic backbone + value .score head.

    score_w is zero-padded to (H, 128) so the value is produced as a
    lane-dense (tm, 128) tile (real value in column 0, sliced by the caller).
    critic_hidden never touches HBM and there is no width-1 masked store.
    """
    x = x_ref[...]
    h1 = jnp.tanh(
        jnp.dot(x, w1_ref[...], preferred_element_type=jnp.float32)
        + b1_ref[...])
    h2 = (jnp.dot(h1.astype(w2_ref.dtype), w2_ref[...],
                  preferred_element_type=jnp.float32)
          + b2_ref[...])
    o_ref[...] = jnp.dot(h2.astype(ws_ref.dtype), ws_ref[...],
                         preferred_element_type=jnp.float32).astype(o_ref.dtype)


# ---------------------------------------------------------------------------
# pallas_call wrappers
# ---------------------------------------------------------------------------
def policy_forward_fused(x, w1, b1, w2, b2, w_lm, b_lm, *, tm, tn, vmem_limit):
    n_pad, h_pad = x.shape
    v_pad = w_lm.shape[1]
    row_tiles, vocab_tiles = n_pad // tm, v_pad // tn
    grid = (row_tiles, vocab_tiles)
    wlm_bufs = max(1, min(_WLM_BUFFERS_MAX, vocab_tiles))

    flops = 2 * n_pad * h_pad * h_pad * 2 + 2 * n_pad * h_pad * v_pad
    bytes_accessed = (
        2 * x.size + 2 * (w1.size + w2.size) + 4 * (b1.size + b2.size)
        + row_tiles * (2 * w_lm.size + 4 * b_lm.size)   # W_lm re-streamed per row tile
        + 4 * n_pad * v_pad)                            # f32 logits out

    return pl.pallas_call(
        _policy_fused_kernel,
        out_shape=jax.ShapeDtypeStruct((n_pad, v_pad), jnp.float32),
        grid=grid,
        in_specs=[
            _spec((tm, h_pad), lambda i, j: (i, 0)),                     # activations
            _spec((h_pad, h_pad), lambda i, j: (0, 0), buffers=1),       # W1 (resident)
            _spec((1, h_pad), lambda i, j: (0, 0), buffers=1),           # b1
            _spec((h_pad, h_pad), lambda i, j: (0, 0), buffers=1),       # W2 (resident)
            _spec((1, h_pad), lambda i, j: (0, 0), buffers=1),           # b2
            _spec((h_pad, tn), lambda i, j: (0, j), buffers=wlm_bufs),   # W_lm vocab tile
            _spec((1, tn), lambda i, j: (0, j), buffers=wlm_bufs),       # b_lm vocab tile
        ],
        out_specs=pl.BlockSpec((tm, tn), lambda i, j: (i, j)),
        scratch_shapes=[pltpu.VMEM((tm, h_pad), jnp.bfloat16)],          # resident hidden
        compiler_params=pltpu.CompilerParams(
            dimension_semantics=("parallel", "arbitrary"),
            vmem_limit_bytes=vmem_limit,
        ),
        cost_estimate=pl.CostEstimate(
            flops=flops,
            transcendentals=n_pad * h_pad,
            bytes_accessed=bytes_accessed),
    )(x, w1, b1, w2, b2, w_lm, b_lm)


def value_forward_fused(x, w1, b1, w2, b2, w_score_padded, *, tm, vmem_limit):
    n_pad, h_pad = x.shape
    grid = (n_pad // tm,)

    flops = 2 * n_pad * h_pad * h_pad * 2 + 2 * n_pad * h_pad * 128
    bytes_accessed = (
        2 * (x.size + w1.size + w2.size + w_score_padded.size)
        + 4 * (b1.size + b2.size)
        + 4 * n_pad * 128)

    return pl.pallas_call(
        _value_fused_kernel,
        out_shape=jax.ShapeDtypeStruct((n_pad, 128), jnp.float32),
        grid=grid,
        in_specs=[
            _spec((tm, h_pad), lambda i: (i, 0)),
            _spec((h_pad, h_pad), lambda i: (0, 0), buffers=1),
            _spec((1, h_pad), lambda i: (0, 0), buffers=1),
            _spec((h_pad, h_pad), lambda i: (0, 0), buffers=1),
            _spec((1, h_pad), lambda i: (0, 0), buffers=1),
            _spec((h_pad, 128), lambda i: (0, 0), buffers=1),
        ],
        out_specs=pl.BlockSpec((tm, 128), lambda i: (i, 0)),
        compiler_params=pltpu.CompilerParams(
            dimension_semantics=("parallel",),
            vmem_limit_bytes=vmem_limit,
        ),
        cost_estimate=pl.CostEstimate(
            flops=flops,
            transcendentals=n_pad * h_pad,
            bytes_accessed=bytes_accessed),
    )(x, w1, b1, w2, b2, w_score_padded)


# ---------------------------------------------------------------------------
# Parameter init / one-time padding (hoisted out of the per-step forward)
# ---------------------------------------------------------------------------
def init_params(key, vocab, hidden):
    ks = jax.random.split(key, 16)
    s = 1.0 / math.sqrt(hidden)

    def _model(k):
        return {
            "embed": jax.random.normal(k[0], (vocab, hidden), jnp.float32
                                       ).astype(jnp.bfloat16),
            "w1": (jax.random.normal(k[1], (hidden, hidden), jnp.float32) * s
                   ).astype(jnp.bfloat16),
            "b1": jax.random.normal(k[2], (1, hidden), jnp.float32) * 0.1,
            "w2": (jax.random.normal(k[3], (hidden, hidden), jnp.float32) * s
                   ).astype(jnp.bfloat16),
            "b2": jax.random.normal(k[4], (1, hidden), jnp.float32) * 0.1,
            "head_w": (jax.random.normal(k[5], (hidden, vocab), jnp.float32) * s
                       ).astype(jnp.bfloat16),
            "head_b": jax.random.normal(k[6], (1, vocab), jnp.float32) * 0.1,
            "score_w": (jax.random.normal(k[7], (hidden, 1), jnp.float32) * s
                        ).astype(jnp.bfloat16),
        }

    return {"policy": _model(ks[:8]), "value": _model(ks[8:])}


def prepare_params(params):
    """One-time padding / tile-geometry selection (NOT part of the jitted step)."""
    budget = _vmem_budget_bytes()
    pol, val = params["policy"], params["value"]
    H = pol["w1"].shape[0]
    V = pol["head_w"].shape[1]
    H_pad = _round_up(H, 128)
    v_pad128 = _round_up(V, 128)

    tm_policy, tn = _select_policy_tiles(H_pad, v_pad128, budget)
    V_pad = _round_up(V, tn)
    tm_value = _select_value_tile(H_pad, budget)

    def pad_model(m, with_lm):
        out = {
            # embed columns pre-padded once -> per-call path is gather + row pad only
            "embed": _pad2(m["embed"], m["embed"].shape[0], H_pad),
            "w1": _pad2(m["w1"], H_pad, H_pad),
            "b1": _pad2(m["b1"], 1, H_pad),
            "w2": _pad2(m["w2"], H_pad, H_pad),
            "b2": _pad2(m["b2"], 1, H_pad),
        }
        if with_lm:
            out["head_w"] = _pad2(m["head_w"], H_pad, V_pad)
            out["head_b"] = _pad2(m["head_b"], 1, V_pad)
        else:
            out["score_w"] = _pad2(m["score_w"], H_pad, 128)   # lane-dense value head
        return out

    prepared = {"policy": pad_model(pol, True), "value": pad_model(val, False)}
    geom = dict(H=H, V=V, H_pad=H_pad, V_pad=V_pad,
                tm_policy=tm_policy, tn=tn, tm_value=tm_value,
                vmem_limit=budget)
    return prepared, geom


# ---------------------------------------------------------------------------
# PolicyAndValueWrapper forward (glue in plain JAX, matmuls in Pallas)
# ---------------------------------------------------------------------------
def policy_and_value_forward(prepared, input_ids, *, geom):
    """Returns (policy_logits (B,S,V), value_logits (B,S,1)) — mirrors
    (self.policy(**kwargs).logits, self.value_model.score(hidden_states[-1]))."""
    B, S = input_ids.shape
    N = B * S
    V = geom["V"]
    vmem_limit = geom["vmem_limit"]

    tm_pol = _row_tile(geom["tm_policy"], N)
    n_pad_pol = _round_up(N, tm_pol)
    tm_val = _row_tile(geom["tm_value"], N)
    n_pad_val = _round_up(N, tm_val)

    pol, val = prepared["policy"], prepared["value"]
    ids = input_ids.reshape(-1)

    # Embedding lookup stays as plain-JAX glue.
    # TODO(synk): fuse the gather into the backbone kernels via
    # PrefetchScalarGridSpec(num_scalar_prefetch=1) + pl.Element row-gather so
    # the (N, H_pad) activations never round-trip HBM before the kernels.
    x_pol = jnp.take(pol["embed"], ids, axis=0)
    x_val = jnp.take(val["embed"], ids, axis=0)
    if n_pad_pol > N:
        x_pol = jnp.pad(x_pol, ((0, n_pad_pol - N), (0, 0)))
    if n_pad_val > N:
        x_val = jnp.pad(x_val, ((0, n_pad_val - N), (0, 0)))

    # Critic backbone + .score head, fully fused (critic_hidden never in HBM).
    value_out = value_forward_fused(
        x_val, val["w1"], val["b1"], val["w2"], val["b2"], val["score_w"],
        tm=tm_val, vmem_limit=vmem_limit)

    # Policy backbone + LM head, fully fused (policy_hidden never in HBM).
    policy_out = policy_forward_fused(
        x_pol, pol["w1"], pol["b1"], pol["w2"], pol["b2"],
        pol["head_w"], pol["head_b"],
        tm=tm_pol, tn=geom["tn"], vmem_limit=vmem_limit)

    policy_logits = policy_out[:N, :V].reshape(B, S, V)
    value_logits = value_out[:N, :1].reshape(B, S, 1)
    return policy_logits, value_logits


def reference_forward(params, input_ids):
    """Pure-JAX reference with the same bf16-operand / f32-accumulate math."""
    B, S = input_ids.shape
    pol, val = params["policy"], params["value"]

    def backbone(m, ids):
        x = jnp.take(m["embed"], ids.reshape(-1), axis=0)              # bf16
        h1 = jnp.tanh(
            jnp.dot(x, m["w1"], preferred_element_type=jnp.float32) + m["b1"])
        h1 = h1.astype(jnp.bfloat16)
        h2 = jnp.dot(h1, m["w2"], preferred_element_type=jnp.float32) + m["b2"]
        return h2.astype(jnp.bfloat16)

    hc = backbone(val, input_ids)
    v = jnp.dot(hc, val["score_w"],
                preferred_element_type=jnp.float32).reshape(B, S, 1)
    hp = backbone(pol, input_ids)
    p = (jnp.dot(hp, pol["head_w"], preferred_element_type=jnp.float32)
         + pol["head_b"]).reshape(B, S, -1)
    return p, v


if __name__ == "__main__":
    B, S, H, V = 2, 8, 32, 64
    key = jax.random.PRNGKey(0)
    k_par, k_ids = jax.random.split(key)

    params = init_params(k_par, vocab=V, hidden=H)
    input_ids = jax.random.randint(k_ids, (B, S), 0, V, dtype=jnp.int32)

    prepared, geom = prepare_params(params)          # one-time padding / tiling
    fwd = jax.jit(functools.partial(policy_and_value_forward, geom=geom))

    policy_logits, value_logits = fwd(prepared, input_ids)
    jax.block_until_ready((policy_logits, value_logits))

    ref_p, ref_v = reference_forward(params, input_ids)
    assert policy_logits.shape == (B, S, V)
    assert value_logits.shape == (B, S, 1)
    assert jnp.allclose(policy_logits, ref_p, atol=2e-3, rtol=2e-2), float(
        jnp.max(jnp.abs(policy_logits - ref_p)))
    assert jnp.allclose(value_logits, ref_v, atol=2e-3, rtol=2e-2), float(
        jnp.max(jnp.abs(value_logits - ref_v)))

    print("KERNEL_OK")
</pallas_src>

<mosaic_0001>
module attributes {stable_mosaic.version = 11 : i64} {
  func.func @_policy_fused_kernel(%arg0: i32, %arg1: i32, %arg2: memref<16x128xbf16, #tpu.memory_space<vmem>>, %arg3: memref<128x128xbf16, #tpu.memory_space<vmem>>, %arg4: memref<1x128xf32, #tpu.memory_space<vmem>>, %arg5: memref<128x128xbf16, #tpu.memory_space<vmem>>, %arg6: memref<1x128xf32, #tpu.memory_space<vmem>>, %arg7: memref<128x128xbf16, #tpu.memory_space<vmem>>, %arg8: memref<1x128xf32, #tpu.memory_space<vmem>>, %arg9: memref<16x128xf32, #tpu.memory_space<vmem>>, %arg10: memref<16x128xbf16, #tpu.memory_space<vmem>>) attributes {dimension_semantics = [#tpu.dimension_semantics<parallel>, #tpu.dimension_semantics<arbitrary>], iteration_bounds = array<i64: 1, 1>, scalar_prefetch = 0 : i64, scratch_operands = 1 : i64, tpu.core_type = #tpu.core_type<tc>, window_params = [{transform_indices = @transform_0, window_bounds = array<i64: 16, 128>}, {pipeline_mode = #tpu.pipeline_mode<synchronous>, transform_indices = @transform_1, window_bounds = array<i64: 128, 128>}, {pipeline_mode = #tpu.pipeline_mode<synchronous>, transform_indices = @transform_2, window_bounds = array<i64: 1, 128>}, {pipeline_mode = #tpu.pipeline_mode<synchronous>, transform_indices = @transform_3, window_bounds = array<i64: 128, 128>}, {pipeline_mode = #tpu.pipeline_mode<synchronous>, transform_indices = @transform_4, window_bounds = array<i64: 1, 128>}, {pipeline_mode = #tpu.pipeline_mode<synchronous>, transform_indices = @transform_5, window_bounds = array<i64: 128, 128>}, {pipeline_mode = #tpu.pipeline_mode<synchronous>, transform_indices = @transform_6, window_bounds = array<i64: 1, 128>}, {transform_indices = @transform_7, window_bounds = array<i64: 16, 128>}]} {
    %c0_i32 = arith.constant 0 : i32
    %0 = arith.cmpi eq, %arg1, %c0_i32 : i32
    %1 = arith.extui %0 : i1 to i32
    %c0_i32_0 = arith.constant 0 : i32
    %2 = arith.cmpi ne, %1, %c0_i32_0 : i32
    scf.if %2 {
      %c0_8 = arith.constant 0 : index
      %c0_9 = arith.constant 0 : index
      %10 = vector.load %arg2[%c0_8, %c0_9] : memref<16x128xbf16, #tpu.memory_space<vmem>>, vector<16x128xbf16>
      %c0_10 = arith.constant 0 : index
      %c0_11 = arith.constant 0 : index
      %11 = vector.load %arg3[%c0_10, %c0_11] : memref<128x128xbf16, #tpu.memory_space<vmem>>, vector<128x128xbf16>
      %cst_12 = arith.constant dense<0.000000e+00> : vector<16x128xf32>
      %12 = tpu.matmul %10, %11, %cst_12 {dimension_numbers = #tpu.dot_dimension_numbers<[1], [0], [0], [1], [0, 0, 1, 1], [], []>} : vector<16x128xbf16>, vector<128x128xbf16>, vector<16x128xf32> -> vector<16x128xf32>
      %c0_13 = arith.constant 0 : index
      %c0_14 = arith.constant 0 : index
      %13 = vector.load %arg4[%c0_13, %c0_14] : memref<1x128xf32, #tpu.memory_space<vmem>>, vector<1x128xf32>
      %14 = vector.broadcast %13 : vector<1x128xf32> to vector<16x128xf32>
      %15 = arith.addf %12, %14 : vector<16x128xf32>
      %16 = math.tanh %15 : vector<16x128xf32>
      %17 = arith.truncf %16 : vector<16x128xf32> to vector<16x128xbf16>
      %c0_15 = arith.constant 0 : index
      %c0_16 = arith.constant 0 : index
      %18 = vector.load %arg5[%c0_15, %c0_16] : memref<128x128xbf16, #tpu.memory_space<vmem>>, vector<128x128xbf16>
      %cst_17 = arith.constant dense<0.000000e+00> : vector<16x128xf32>
      %19 = tpu.matmul %17, %18, %cst_17 {dimension_numbers = #tpu.dot_dimension_numbers<[1], [0], [0], [1], [0, 0, 1, 1], [], []>} : vector<16x128xbf16>, vector<128x128xbf16>, vector<16x128xf32> -> vector<16x128xf32>
      %c0_18 = arith.constant 0 : index
      %c0_19 = arith.constant 0 : index
      %20 = vector.load %arg6[%c0_18, %c0_19] : memref<1x128xf32, #tpu.memory_space<vmem>>, vector<1x128xf32>
      %21 = vector.broadcast %20 : vector<1x128xf32> to vector<16x128xf32>
      %22 = arith.addf %19, %21 : vector<16x128xf32>
      %23 = arith.truncf %22 : vector<16x128xf32> to vector<16x128xbf16>
      %c0_20 = arith.constant 0 : index
      %c0_21 = arith.constant 0 : index
      %24 = vector.load %arg10[%c0_20, %c0_21] : memref<16x128xbf16, #tpu.memory_space<vmem>>, vector<16x128xbf16>
      tpu.vector_store %arg10[%c0_20, %c0_21], %23 {strides = array<i32>} : memref<16x128xbf16, #tpu.memory_space<vmem>>, vector<16x128xbf16>,
    } else {
    }
    %c0 = arith.constant 0 : index
    %c0_1 = arith.constant 0 : index
    %3 = vector.load %arg10[%c0, %c0_1] : memref<16x128xbf16, #tpu.memory_space<vmem>>, vector<16x128xbf16>
    %c0_2 = arith.constant 0 : index
    %c0_3 = arith.constant 0 : index
    %4 = vector.load %arg7[%c0_2, %c0_3] : memref<128x128xbf16, #tpu.memory_space<vmem>>, vector<128x128xbf16>
    %cst = arith.constant dense<0.000000e+00> : vector<16x128xf32>
    %5 = tpu.matmul %3, %4, %cst {dimension_numbers = #tpu.dot_dimension_numbers<[1], [0], [0], [1], [0, 0, 1, 1], [], []>} : vector<16x128xbf16>, vector<128x128xbf16>, vector<16x128xf32> -> vector<16x128xf32>
    %c0_4 = arith.constant 0 : index
    %c0_5 = arith.constant 0 : index
    %6 = vector.load %arg8[%c0_4, %c0_5] : memref<1x128xf32, #tpu.memory_space<vmem>>, vector<1x128xf32>
    %7 = vector.broadcast %6 : vector<1x128xf32> to vector<16x128xf32>
    %8 = arith.addf %5, %7 : vector<16x128xf32>
    %c0_6 = arith.constant 0 : index
    %c0_7 = arith.constant 0 : index
    %9 = vector.load %arg9[%c0_6, %c0_7] : memref<16x128xf32, #tpu.memory_space<vmem>>, vector<16x128xf32>
    tpu.vector_store %arg9[%c0_6, %c0_7], %8 {strides = array<i32>} : memref<16x128xf32, #tpu.memory_space<vmem>>, vector<16x128xf32>,
    return
  }
  func.func @transform_0(%arg0: i32, %arg1: i32) -> (i32, i32) {
    %c0_i32 = arith.constant 0 : i32
    %c0_i32_0 = arith.constant 0 : i32
    return %arg0, %c0_i32 : i32, i32
  }
  func.func @transform_1(%arg0: i32, %arg1: i32) -> (i32, i32) {
    %c0_i32 = arith.constant 0 : i32
    %c0_i32_0 = arith.constant 0 : i32
    %c0_i32_1 = arith.constant 0 : i32
    return %c0_i32, %c0_i32_0 : i32, i32
  }
  func.func @transform_2(%arg0: i32, %arg1: i32) -> (i32, i32) {
    %c0_i32 = arith.constant 0 : i32
    %c0_i32_0 = arith.constant 0 : i32
    %c0_i32_1 = arith.constant 0 : i32
    return %c0_i32, %c0_i32_0 : i32, i32
  }
  func.func @transform_3(%arg0: i32, %arg1: i32) -> (i32, i32) {
    %c0_i32 = arith.constant 0 : i32
    %c0_i32_0 = arith.constant 0 : i32
    %c0_i32_1 = arith.constant 0 : i32
    return %c0_i32, %c0_i32_0 : i32, i32
  }
  func.func @transform_4(%arg0: i32, %arg1: i32) -> (i32, i32) {
    %c0_i32 = arith.constant 0 : i32
    %c0_i32_0 = arith.constant 0 : i32
    %c0_i32_1 = arith.constant 0 : i32
    return %c0_i32, %c0_i32_0 : i32, i32
  }
  func.func @transform_5(%arg0: i32, %arg1: i32) -> (i32, i32) {
    %c0_i32 = arith.constant 0 : i32
    %c0_i32_0 = arith.constant 0 : i32
    return %c0_i32, %arg1 : i32, i32
  }
  func.func @transform_6(%arg0: i32, %arg1: i32) -> (i32, i32) {
    %c0_i32 = arith.constant 0 : i32
    %c0_i32_0 = arith.constant 0 : i32
    return %c0_i32, %arg1 : i32, i32
  }
  func.func @transform_7(%arg0: i32, %arg1: i32) -> (i32, i32) {
    %c0_i32 = arith.constant 0 : i32
    return %arg0, %arg1 : i32, i32
  }
}

module attributes {stable_mosaic.version = 11 : i64} {
  func.func @_value_fused_kernel(%arg0: i32, %arg1: memref<16x128xbf16, #tpu.memory_space<vmem>>, %arg2: memref<128x128xbf16, #tpu.memory_space<vmem>>, %arg3: memref<1x128xf32, #tpu.memory_space<vmem>>, %arg4: memref<128x128xbf16, #tpu.memory_space<vmem>>, %arg5: memref<1x128xf32, #tpu.memory_space<vmem>>, %arg6: memref<128x128xbf16, #tpu.memory_space<vmem>>, %arg7: memref<16x128xf32, #tpu.memory_space<vmem>>) attributes {dimension_semantics = [#tpu.dimension_semantics<parallel>], iteration_bounds = array<i64: 1>, scalar_prefetch = 0 : i64, scratch_operands = 0 : i64, tpu.core_type = #tpu.core_type<tc>, window_params = [{transform_indices = @transform_0, window_bounds = array<i64: 16, 128>}, {pipeline_mode = #tpu.pipeline_mode<synchronous>, transform_indices = @transform_1, window_bounds = array<i64: 128, 128>}, {pipeline_mode = #tpu.pipeline_mode<synchronous>, transform_indices = @transform_2, window_bounds = array<i64: 1, 128>}, {pipeline_mode = #tpu.pipeline_mode<synchronous>, transform_indices = @transform_3, window_bounds = array<i64: 128, 128>}, {pipeline_mode = #tpu.pipeline_mode<synchronous>, transform_indices = @transform_4, window_bounds = array<i64: 1, 128>}, {pipeline_mode = #tpu.pipeline_mode<synchronous>, transform_indices = @transform_5, window_bounds = array<i64: 128, 128>}, {transform_indices = @transform_6, window_bounds = array<i64: 16, 128>}]} {
    %c0 = arith.constant 0 : index
    %c0_0 = arith.constant 0 : index
    %0 = vector.load %arg1[%c0, %c0_0] : memref<16x128xbf16, #tpu.memory_space<vmem>>, vector<16x128xbf16>
    %c0_1 = arith.constant 0 : index
    %c0_2 = arith.constant 0 : index
    %1 = vector.load %arg2[%c0_1, %c0_2] : memref<128x128xbf16, #tpu.memory_space<vmem>>, vector<128x128xbf16>
    %cst = arith.constant dense<0.000000e+00> : vector<16x128xf32>
    %2 = tpu.matmul %0, %1, %cst {dimension_numbers = #tpu.dot_dimension_numbers<[1], [0], [0], [1], [0, 0, 1, 1], [], []>} : vector<16x128xbf16>, vector<128x128xbf16>, vector<16x128xf32> -> vector<16x128xf32>
    %c0_3 = arith.constant 0 : index
    %c0_4 = arith.constant 0 : index
    %3 = vector.load %arg3[%c0_3, %c0_4] : memref<1x128xf32, #tpu.memory_space<vmem>>, vector<1x128xf32>
    %4 = vector.broadcast %3 : vector<1x128xf32> to vector<16x128xf32>
    %5 = arith.addf %2, %4 : vector<16x128xf32>
    %6 = math.tanh %5 : vector<16x128xf32>
    %7 = arith.truncf %6 : vector<16x128xf32> to vector<16x128xbf16>
    %c0_5 = arith.constant 0 : index
    %c0_6 = arith.constant 0 : index
    %8 = vector.load %arg4[%c0_5, %c0_6] : memref<128x128xbf16, #tpu.memory_space<vmem>>, vector<128x128xbf16>
    %cst_7 = arith.constant dense<0.000000e+00> : vector<16x128xf32>
    %9 = tpu.matmul %7, %8, %cst_7 {dimension_numbers = #tpu.dot_dimension_numbers<[1], [0], [0], [1], [0, 0, 1, 1], [], []>} : vector<16x128xbf16>, vector<128x128xbf16>, vector<16x128xf32> -> vector<16x128xf32>
    %c0_8 = arith.constant 0 : index
    %c0_9 = arith.constant 0 : index
    %10 = vector.load %arg5[%c0_8, %c0_9] : memref<1x128xf32, #tpu.memory_space<vmem>>, vector<1x128xf32>
    %11 = vector.broadcast %10 : vector<1x128xf32> to vector<16x128xf32>
    %12 = arith.addf %9, %11 : vector<16x128xf32>
    %13 = arith.truncf %12 : vector<16x128xf32> to vector<16x128xbf16>
    %c0_10 = arith.constant 0 : index
    %c0_11 = arith.constant 0 : index
    %14 = vector.load %arg6[%c0_10, %c0_11] : memref<128x128xbf16, #tpu.memory_space<vmem>>, vector<128x128xbf16>
    %cst_12 = arith.constant dense<0.000000e+00> : vector<16x128xf32>
    %15 = tpu.matmul %13, %14, %cst_12 {dimension_numbers = #tpu.dot_dimension_numbers<[1], [0], [0], [1], [0, 0, 1, 1], [], []>} : vector<16x128xbf16>, vector<128x128xbf16>, vector<16x128xf32> -> vector<16x128xf32>
    %c0_13 = arith.constant 0 : index
    %c0_14 = arith.constant 0 : index
    %16 = vector.load %arg7[%c0_13, %c0_14] : memref<16x128xf32, #tpu.memory_space<vmem>>, vector<16x128xf32>
    tpu.vector_store %arg7[%c0_13, %c0_14], %15 {strides = array<i32>} : memref<16x128xf32, #tpu.memory_space<vmem>>, vector<16x128xf32>,
    return
  }
  func.func @transform_0(%arg0: i32) -> (i32, i32) {
    %c0_i32 = arith.constant 0 : i32
    %c0_i32_0 = arith.constant 0 : i32
    return %arg0, %c0_i32 : i32, i32
  }
  func.func @transform_1(%arg0: i32) -> (i32, i32) {
    %c0_i32 = arith.constant 0 : i32
    %c0_i32_0 = arith.constant 0 : i32
    %c0_i32_1 = arith.constant 0 : i32
    return %c0_i32, %c0_i32_0 : i32, i32
  }
  func.func @transform_2(%arg0: i32) -> (i32, i32) {
    %c0_i32 = arith.constant 0 : i32
    %c0_i32_0 = arith.constant 0 : i32
    %c0_i32_1 = arith.constant 0 : i32
    return %c0_i32, %c0_i32_0 : i32, i32
  }
  func.func @transform_3(%arg0: i32) -> (i32, i32) {
    %c0_i32 = arith.constant 0 : i32
    %c0_i32_0 = arith.constant 0 : i32
    %c0_i32_1 = arith.constant 0 : i32
    return %c0_i32, %c0_i32_0 : i32, i32
  }
  func.func @transform_4(%arg0: i32) -> (i32, i32) {
    %c0_i32 = arith.constant 0 : i32
    %c0_i32_0 = arith.constant 0 : i32
    %c0_i32_1 = arith.constant 0 : i32
    return %c0_i32, %c0_i32_0 : i32, i32
  }
  func.func @transform_5(%arg0: i32) -> (i32, i32) {
    %c0_i32 = arith.constant 0 : i32
    %c0_i32_0 = arith.constant 0 : i32
    %c0_i32_1 = arith.constant 0 : i32
    return %c0_i32, %c0_i32_0 : i32, i32
  }
  func.func @transform_6(%arg0: i32) -> (i32, i32) {
    %c0_i32 = arith.constant 0 : i32
    %c0_i32_0 = arith.constant 0 : i32
    return %arg0, %c0_i32 : i32, i32
  }
}

</mosaic_0001>

<bundles_post_ra>
// kernel: policy_and_value_forward.2
= control target key start
LH: loop header
LB: loop body
LE: loop exit
PB: predicated region body
PF: predicated region fallthrough
CT: control target
= control target key end

     0   :  { %11 = vsyncpa [#allocation3], 0  ;;  %s556_s21 = smov [#allocation2]   ;;  %s692_s0 = inlined_call_operand.vmem [shape: bf16[16,128], index: 0, kind: input, shape index: {}]   ;;  %s693_s1 = inlined_call_operand.vmem [shape: bf16[128,128], index: 1, kind: input, shape index: {}]   ;;  %s694_s2 = inlined_call_operand.vmem [shape: f32[1,128], index: 2, kind: input, shape index: {}]   ;;  %s695_s3 = inlined_call_operand.vmem [shape: bf16[128,128], index: 3, kind: input, shape index: {}]   ;;  %s696_s4 = inlined_call_operand.vmem [shape: f32[1,128], index: 4, kind: input, shape index: {}]   ;;  %s697_s5 = inlined_call_operand.hbm [shape: bf16[128,128], index: 5, kind: input, shape index: {}]   ;;  %s698_s6 = inlined_call_operand.vmem [shape: f32[16,128], index: 6, kind: output, shape index: {}]  }
   0x1   :  { %s27_s22 = sshll.u32 %s556_s21, 4  ;;  %s28_s22 = int_to_ptr.vmem [resolvable:$true] %s27_s22 }
   0x2   :  { %s542_s23 = scalar_lea.vmem %s28_s22, 1024  ;;  %p547_p1 = scmp.lt.s32.totalorder %s28_s22, %s28_s22 }
   0x3   :  { %p543_p0 = scmp.ne.s32.totalorder %s28_s22, %s542_s23  ;;  %p548_p2 = scmp.lt.s32.totalorder %s542_s23, %s542_s23 }
   0x5   :  { %p549_p3 = por %p548_p2, %p547_p1 }
   0x7   :  { %p550_p4 = pnand %p549_p3, %p543_p0 }
   0x9   :  { %553 = shalt.err (!%p550_p4)
}
   0xa   :  { %s557_s24 = smov 64   ;;  %s558_s25 = smov 4  }
   0xb   :  { %33 = dma.hbm_to_vmem [thread:$0]  %s697_s5, 1024, %s28_s22, [#allocation3], %s557_s24, %s557_s24, %s558_s25  }
   0xc   :  { %554 = dma.done.wait [#allocation3], 1024  }
   0xd   :  { %555 = vsyncadd [#allocation3], 4294966272  ;;  %v559_v0 = vmov 0.0   ;;  %vm560_vm0 = vmmov 0   ;;  %v505_v1 = vld [vmem:[%s693_s1 + $0x38] sm:$0xff]   ;;  %v506_v2 = vld [vmem:[%s693_s1 + $0x30] sm:$0xff]  }
   0xe   :  { %440 = vmatprep.subr.bf16.mxu0 %v559_v0  ;;  %456 = vmatprep.mubr.msk.bf16.mxu0 %vm560_vm0, %v559_v0  ;;  %v507_v3 = vld [vmem:[%s693_s1 + $0x28] sm:$0xff]   ;;  %v514_v4 = vld [vmem:[%s695_s3 + $0x38] sm:$0xff]   ;;  %v508_v5 = vld [vmem:[%s693_s1 + $0x20] sm:$0xff]  }
   0xf   :  { %460 = vmatprep.subr.bf16.mxu1 %v559_v0  ;;  %476 = vmatprep.mubr.msk.bf16.mxu1 %vm560_vm0, %v559_v0  ;;  %v515_v6 = vld [vmem:[%s695_s3 + $0x30] sm:$0xff]   ;;  %v509_v7 = vld [vmem:[%s693_s1 + $0x18] sm:$0xff]   ;;  %v511_v9 = vld [vmem:[%s693_s1 + $0x8] sm:$0xff]  }
  0x10   :  { %441 = vmatpush3.bf16.msra.mxu0 %v505_v1  ;;  %461 = vmatpush3.bf16.msra.mxu1 %v514_v4  ;;  %v510_v8 = vld [vmem:[%s693_s1 + $0x10] sm:$0xff]   ;;  %v512_v10 = vld [vmem:[%s693_s1] sm:$0xff]   ;;  %v516_v12 = vld [vmem:[%s695_s3 + $0x28] sm:$0xff]  }
  0x11   :  { %442 = vmatprep.subr.bf16.mxu0 %v559_v0  ;;  %462 = vmatprep.subr.bf16.mxu1 %v559_v0  ;;  %v513_v11 = vld [vmem:[%s692_s0] sm:$0xff]   ;;  %v518_v14 = vld [vmem:[%s695_s3 + $0x18] sm:$0xff]   ;;  %v519_v15 = vld [vmem:[%s695_s3 + $0x10] sm:$0xff]  }
  0x12   :  { %v517_v13 = vld [vmem:[%s695_s3 + $0x20] sm:$0xff]   ;;  %v520_v16 = vld [vmem:[%s695_s3 + $0x8] sm:$0xff]   ;;  %v522_v18 = vld [vmem:[#allocation2 + $0x38] sm:$0xff]  }
  0x13   :  { %v521_v17 = vld [vmem:[%s695_s3] sm:$0xff]   ;;  %v523_v19 = vld [vmem:[#allocation2 + $0x30] sm:$0xff]   ;;  %v524_v20 = vld [vmem:[#allocation2 + $0x28] sm:$0xff]  }
  0x14   :  { %443 = vmatpush3.bf16.msra.mxu0 %v506_v2  ;;  %463 = vmatpush3.bf16.msra.mxu1 %v515_v6  ;;  %v525_v21 = vld [vmem:[#allocation2 + $0x20] sm:$0xff]   ;;  %v526_v22 = vld [vmem:[#allocation2 + $0x18] sm:$0xff]   ;;  %v527_v23 = vld [vmem:[#allocation2 + $0x10] sm:$0xff]  }
  0x15   :  { %444 = vmatprep.subr.bf16.mxu0 %v559_v0  ;;  %464 = vmatprep.subr.bf16.mxu1 %v559_v0  ;;  %v386_v24 = vld [vmem:[%s694_s2] ss:$0 sm:$0xff]  ;;  %v528_v34 = vld [vmem:[#allocation2 + $0x8] sm:$0xff]  }
  0x16   :  { %v529_v35 = vld [vmem:[#allocation2] sm:$0xff]  }
  0x17   :  { %v396_v37 = vld [vmem:[%s696_s4] ss:$0 sm:$0xff] }
  0x18   :  { %445 = vmatpush3.bf16.msra.mxu0 %v507_v3  ;;  %465 = vmatpush3.bf16.msra.mxu1 %v516_v12 }
  0x19   :  { %446 = vmatprep.subr.bf16.mxu0 %v559_v0  ;;  %466 = vmatprep.subr.bf16.mxu1 %v559_v0 }
  0x1c   :  { %447 = vmatpush3.bf16.msra.mxu0 %v508_v5  ;;  %467 = vmatpush3.bf16.msra.mxu1 %v517_v13 }
  0x1d   :  { %448 = vmatprep.subr.bf16.mxu0 %v559_v0  ;;  %468 = vmatprep.subr.bf16.mxu1 %v559_v0 }
  0x20   :  { %449 = vmatpush3.bf16.msra.mxu0 %v509_v7  ;;  %469 = vmatpush3.bf16.msra.mxu1 %v518_v14 }
  0x21   :  { %450 = vmatprep.subr.bf16.mxu0 %v559_v0  ;;  %470 = vmatprep.subr.bf16.mxu1 %v559_v0 }
  0x24   :  { %451 = vmatpush3.bf16.msra.mxu0 %v510_v8  ;;  %471 = vmatpush3.bf16.msra.mxu1 %v519_v15 }
  0x25   :  { %452 = vmatprep.subr.bf16.mxu0 %v559_v0  ;;  %472 = vmatprep.subr.bf16.mxu1 %v559_v0 }
  0x28   :  { %453 = vmatpush3.bf16.msra.mxu0 %v511_v9  ;;  %473 = vmatpush3.bf16.msra.mxu1 %v520_v16 }
  0x29   :  { %454 = vmatprep.subr.bf16.mxu0 %v559_v0  ;;  %474 = vmatprep.subr.bf16.mxu1 %v559_v0 }
  0x2c   :  { %455 = vmatpush3.bf16.msra.mxu0 %v512_v10  ;;  %475 = vmatpush3.bf16.msra.mxu1 %v521_v17 }
  0x2d   :  { %480 = vmatprep.subr.bf16.mxu0 %v559_v0 }
  0x2f   :  { %457 = vmatmul.mubr.bf16.vlgmr.msra.gmra.mxu0 %v513_v11 }
  0x30   :  { %496 = vmatprep.mubr.msk.bf16.mxu0 %vm560_vm0, %v559_v0  ;;  %481 = vmatpush3.bf16.msra.mxu0 %v522_v18 }
  0x31   :  { %482 = vmatprep.subr.bf16.mxu0 %v559_v0 }
  0x34   :  { %483 = vmatpush3.bf16.msra.mxu0 %v523_v19 }
  0x35   :  { %484 = vmatprep.subr.bf16.mxu0 %v559_v0 }
  0x38   :  { %485 = vmatpush3.bf16.msra.mxu0 %v524_v20 }
  0x39   :  { %486 = vmatprep.subr.bf16.mxu0 %v559_v0 }
  0x3c   :  { %487 = vmatpush3.bf16.msra.mxu0 %v525_v21 }
  0x3d   :  { %488 = vmatprep.subr.bf16.mxu0 %v559_v0 }
  0x40   :  { %489 = vmatpush3.bf16.msra.mxu0 %v526_v22 }
  0x41   :  { %490 = vmatprep.subr.bf16.mxu0 %v559_v0 }
  0x44   :  { %491 = vmatpush3.bf16.msra.mxu0 %v527_v23 }
  0x45   :  { %492 = vmatprep.subr.bf16.mxu0 %v559_v0 }
  0x48   :  { %493 = vmatpush3.bf16.msra.mxu0 %v528_v34 }
  0x49   :  { %494 = vmatprep.subr.bf16.mxu0 %v559_v0 }
  0x4c   :  { %495 = vmatpush3.bf16.msra.mxu0 %v529_v35 }
  0xef   :  { %v151_v25 = vpop.f32.mrf.mxu0 }
  0xf0   :  { %v152_v26 = vadd.f32 %v386_v24, %v151_v25 }
  0xf1   :  { %v458_v27 = vpop.f32.mrf.mxu0 }
  0xf2   :  { %530 = vtanh.f32 %v152_v26 }
  0xf3   :  { %v154_v28 = vpop.f32.mrf.mxu0 }
  0xf4   :  { %v155_v29 = vadd.f32 %v386_v24, %v154_v28 }
  0xf5   :  { %v459_v30 = vpop.f32.mrf.mxu0 }
  0xf6   :  { %532 = vtanh.f32 %v155_v29 }
  0xff   :  { %v531_v31 = vpop.eup %530 }
 0x103   :  { %v533_v32 = vpop.eup %532 }
 0x104   :  { %v160_v33 = vpack.c.bf16 %v533_v32, %v531_v31 }
 0x106   :  { %477 = vmatmul.mubr.bf16.vlgmr.msra.gmra.mxu1 %v160_v33 }
 0x1c6   :  { %v266_v36 = vpop.f32.mrf.mxu1 }
 0x1c7   :  { %v267_v40 = vadd.f32 %v396_v37, %v266_v36 }
 0x1c8   :  { %v478_v38 = vpop.f32.mrf.mxu1 }
 0x1ca   :  { %v269_v39 = vpop.f32.mrf.mxu1 }
 0x1cb   :  { %v270_v41 = vadd.f32 %v396_v37, %v269_v39 }
 0x1cc   :  { %v479_v42 = vpop.f32.mrf.mxu1 }
 0x1cd   :  { %v273_v43 = vpack.c.bf16 %v270_v41, %v267_v40 }
 0x1cf   :  { %497 = vmatmul.mubr.bf16.vlgmr.msra.gmra.mxu0 %v273_v43 }
 0x28f   :  { %v372_v44 = vpop.f32.mrf.mxu0 }
 0x290   :  { %379 = vst [vmem:[%s698_s6] sm:$0xff] %v372_v44 }
 0x291   :  { %v498_v45 = vpop.f32.mrf.mxu0 }
 0x293   :  { %v375_v46 = vpop.f32.mrf.mxu0 }
 0x294   :  { %380 = vst [vmem:[%s698_s6 + $0x8] sm:$0xff] %v375_v46 }
 0x295   :  { %v499_v47 = vpop.f32.mrf.mxu0 }
 0x296   :  { %385 = vsyncpa [#allocation3], 1 }

// kernel: policy_and_value_forward.3
= control target key start
LH: loop header
LB: loop body
LE: loop exit
PB: predicated region body
PF: predicated region fallthrough
CT: control target
= control target key end

     0   :  { %v559_v0 = vmov 0.0   ;;  %vm560_vm0 = vmmov 0   ;;  %s721_s1 = inlined_call_operand.vmem [shape: bf16[128,128], index: 1, kind: input, shape index: {}]   ;;  %s722_s3 = inlined_call_operand.vmem [shape: bf16[128,128], index: 3, kind: input, shape index: {}]   ;;  %s723_s0 = inlined_call_operand.vmem [shape: bf16[16,128], index: 0, kind: input, shape index: {}]   ;;  %s724_s5 = inlined_call_operand.vmem [shape: bf16[128,128], index: 5, kind: input, shape index: {}]   ;;  %s725_s2 = inlined_call_operand.vmem [shape: f32[1,128], index: 2, kind: input, shape index: {}]   ;;  %s726_s4 = inlined_call_operand.vmem [shape: f32[1,128], index: 4, kind: input, shape index: {}]   ;;  %s727_s6 = inlined_call_operand.vmem [shape: f32[1,128], index: 6, kind: input, shape index: {}]   ;;  %s728_s7 = inlined_call_operand.vmem [shape: f32[16,128], index: 7, kind: output, shape index: {}]  }
   0x1   :  { %467 = vmatprep.subr.bf16.mxu0 %v559_v0  ;;  %v529_v1 = vld [vmem:[%s721_s1 + $0x38] sm:$0xff]   ;;  %483 = vmatprep.mubr.msk.bf16.mxu0 %vm560_vm0, %v559_v0  ;;  %v530_v2 = vld [vmem:[%s721_s1 + $0x30] sm:$0xff]   ;;  %v531_v3 = vld [vmem:[%s721_s1 + $0x28] sm:$0xff]  }
   0x2   :  { %487 = vmatprep.subr.bf16.mxu1 %v559_v0  ;;  %503 = vmatprep.mubr.msk.bf16.mxu1 %vm560_vm0, %v559_v0  ;;  %v538_v4 = vld [vmem:[%s722_s3 + $0x38] sm:$0xff]   ;;  %v532_v5 = vld [vmem:[%s721_s1 + $0x20] sm:$0xff]   ;;  %v539_v6 = vld [vmem:[%s722_s3 + $0x30] sm:$0xff]  }
   0x3   :  { %468 = vmatpush3.bf16.msra.mxu0 %v529_v1  ;;  %488 = vmatpush3.bf16.msra.mxu1 %v538_v4  ;;  %v533_v7 = vld [vmem:[%s721_s1 + $0x18] sm:$0xff]   ;;  %v534_v8 = vld [vmem:[%s721_s1 + $0x10] sm:$0xff]   ;;  %v535_v9 = vld [vmem:[%s721_s1 + $0x8] sm:$0xff]  }
   0x4   :  { %469 = vmatprep.subr.bf16.mxu0 %v559_v0  ;;  %489 = vmatprep.subr.bf16.mxu1 %v559_v0  ;;  %v536_v10 = vld [vmem:[%s721_s1] sm:$0xff]   ;;  %v540_v12 = vld [vmem:[%s722_s3 + $0x28] sm:$0xff]   ;;  %v542_v14 = vld [vmem:[%s722_s3 + $0x18] sm:$0xff]  }
   0x5   :  { %v537_v11 = vld [vmem:[%s723_s0] sm:$0xff]   ;;  %v543_v15 = vld [vmem:[%s722_s3 + $0x10] sm:$0xff]   ;;  %v544_v16 = vld [vmem:[%s722_s3 + $0x8] sm:$0xff]  }
   0x6   :  { %v541_v13 = vld [vmem:[%s722_s3 + $0x20] sm:$0xff]   ;;  %v546_v18 = vld [vmem:[%s724_s5 + $0x38] sm:$0xff]   ;;  %v547_v19 = vld [vmem:[%s724_s5 + $0x30] sm:$0xff]  }
   0x7   :  { %470 = vmatpush3.bf16.msra.mxu0 %v530_v2  ;;  %490 = vmatpush3.bf16.msra.mxu1 %v539_v6  ;;  %v545_v17 = vld [vmem:[%s722_s3] sm:$0xff]   ;;  %v548_v20 = vld [vmem:[%s724_s5 + $0x28] sm:$0xff]   ;;  %v550_v32 = vld [vmem:[%s724_s5 + $0x18] sm:$0xff]  }
   0x8   :  { %471 = vmatprep.subr.bf16.mxu0 %v559_v0  ;;  %491 = vmatprep.subr.bf16.mxu1 %v559_v0  ;;  %v402_v21 = vld [vmem:[%s725_s2] ss:$0 sm:$0xff]  ;;  %v551_v33 = vld [vmem:[%s724_s5 + $0x10] sm:$0xff]   ;;  %v552_v34 = vld [vmem:[%s724_s5 + $0x8] sm:$0xff]  }
   0x9   :  { %v549_v31 = vld [vmem:[%s724_s5 + $0x20] sm:$0xff]  }
   0xa   :  { %v553_v35 = vld [vmem:[%s724_s5] sm:$0xff]  }
   0xb   :  { %472 = vmatpush3.bf16.msra.mxu0 %v531_v3  ;;  %492 = vmatpush3.bf16.msra.mxu1 %v540_v12  ;;  %v412_v37 = vld [vmem:[%s726_s4] ss:$0 sm:$0xff] }
   0xc   :  { %473 = vmatprep.subr.bf16.mxu0 %v559_v0  ;;  %493 = vmatprep.subr.bf16.mxu1 %v559_v0  ;;  %v423_v45 = vld [vmem:[%s727_s6] ss:$0 sm:$0xff] }
   0xf   :  { %474 = vmatpush3.bf16.msra.mxu0 %v532_v5  ;;  %494 = vmatpush3.bf16.msra.mxu1 %v541_v13 }
  0x10   :  { %475 = vmatprep.subr.bf16.mxu0 %v559_v0  ;;  %495 = vmatprep.subr.bf16.mxu1 %v559_v0 }
  0x13   :  { %476 = vmatpush3.bf16.msra.mxu0 %v533_v7  ;;  %496 = vmatpush3.bf16.msra.mxu1 %v542_v14 }
  0x14   :  { %477 = vmatprep.subr.bf16.mxu0 %v559_v0  ;;  %497 = vmatprep.subr.bf16.mxu1 %v559_v0 }
  0x17   :  { %478 = vmatpush3.bf16.msra.mxu0 %v534_v8  ;;  %498 = vmatpush3.bf16.msra.mxu1 %v543_v15 }
  0x18   :  { %479 = vmatprep.subr.bf16.mxu0 %v559_v0  ;;  %499 = vmatprep.subr.bf16.mxu1 %v559_v0 }
  0x1b   :  { %480 = vmatpush3.bf16.msra.mxu0 %v535_v9  ;;  %500 = vmatpush3.bf16.msra.mxu1 %v544_v16 }
  0x1c   :  { %481 = vmatprep.subr.bf16.mxu0 %v559_v0  ;;  %501 = vmatprep.subr.bf16.mxu1 %v559_v0 }
  0x1f   :  { %482 = vmatpush3.bf16.msra.mxu0 %v536_v10  ;;  %502 = vmatpush3.bf16.msra.mxu1 %v545_v17 }
  0x20   :  { %507 = vmatprep.subr.bf16.mxu0 %v559_v0 }
  0x22   :  { %484 = vmatmul.mubr.bf16.vlgmr.msra.gmra.mxu0 %v537_v11 }
  0x23   :  { %523 = vmatprep.mubr.msk.bf16.mxu0 %vm560_vm0, %v559_v0  ;;  %508 = vmatpush3.bf16.msra.mxu0 %v546_v18 }
  0x24   :  { %509 = vmatprep.subr.bf16.mxu0 %v559_v0 }
  0x27   :  { %510 = vmatpush3.bf16.msra.mxu0 %v547_v19 }
  0x28   :  { %511 = vmatprep.subr.bf16.mxu0 %v559_v0 }
  0x2b   :  { %512 = vmatpush3.bf16.msra.mxu0 %v548_v20 }
  0x2c   :  { %513 = vmatprep.subr.bf16.mxu0 %v559_v0 }
  0x2f   :  { %514 = vmatpush3.bf16.msra.mxu0 %v549_v31 }
  0x30   :  { %515 = vmatprep.subr.bf16.mxu0 %v559_v0 }
  0x33   :  { %516 = vmatpush3.bf16.msra.mxu0 %v550_v32 }
  0x34   :  { %517 = vmatprep.subr.bf16.mxu0 %v559_v0 }
  0x37   :  { %518 = vmatpush3.bf16.msra.mxu0 %v551_v33 }
  0x38   :  { %519 = vmatprep.subr.bf16.mxu0 %v559_v0 }
  0x3b   :  { %520 = vmatpush3.bf16.msra.mxu0 %v552_v34 }
  0x3c   :  { %521 = vmatprep.subr.bf16.mxu0 %v559_v0 }
  0x3f   :  { %522 = vmatpush3.bf16.msra.mxu0 %v553_v35 }
  0xe2   :  { %v144_v22 = vpop.f32.mrf.mxu0 }
  0xe3   :  { %v145_v23 = vadd.f32 %v402_v21, %v144_v22 }
  0xe4   :  { %v485_v24 = vpop.f32.mrf.mxu0 }
  0xe5   :  { %555 = vtanh.f32 %v145_v23 }
  0xe6   :  { %v147_v25 = vpop.f32.mrf.mxu0 }
  0xe7   :  { %v148_v26 = vadd.f32 %v402_v21, %v147_v25 }
  0xe8   :  { %v486_v27 = vpop.f32.mrf.mxu0 }
  0xe9   :  { %557 = vtanh.f32 %v148_v26 }
  0xf2   :  { %v556_v28 = vpop.eup %555 }
  0xf6   :  { %v558_v29 = vpop.eup %557 }
  0xf7   :  { %v153_v30 = vpack.c.bf16 %v558_v29, %v556_v28 }
  0xf9   :  { %504 = vmatmul.mubr.bf16.vlgmr.msra.gmra.mxu1 %v153_v30 }
 0x1b9   :  { %v259_v36 = vpop.f32.mrf.mxu1 }
 0x1ba   :  { %v260_v40 = vadd.f32 %v412_v37, %v259_v36 }
 0x1bb   :  { %v505_v38 = vpop.f32.mrf.mxu1 }
 0x1bd   :  { %v262_v39 = vpop.f32.mrf.mxu1 }
 0x1be   :  { %v263_v41 = vadd.f32 %v412_v37, %v262_v39 }
 0x1bf   :  { %v506_v42 = vpop.f32.mrf.mxu1 }
 0x1c0   :  { %v438_v43 = vpack.c.bf16 %v263_v41, %v260_v40 }
 0x1c2   :  { %439 = vst [vmem:[#allocation2] sm:$0xff] %v438_v43  }
 0x1c9   :  { %v554_v44 = vld [vmem:[#allocation2] sm:$0xff]  }
 0x1ca   :  { %524 = vmatmul.mubr.bf16.vlgmr.msra.gmra.mxu0 %v554_v44 }
 0x28a   :  { %v389_v46 = vpop.f32.mrf.mxu0 }
 0x28b   :  { %v390_v47 = vadd.f32 %v423_v45, %v389_v46 }
 0x28c   :  { %v525_v48 = vpop.f32.mrf.mxu0 }
 0x28d   :  { %396 = vst [vmem:[%s728_s7] sm:$0xff] %v390_v47 }
 0x28e   :  { %v392_v49 = vpop.f32.mrf.mxu0 }
 0x28f   :  { %v393_v50 = vadd.f32 %v423_v45, %v392_v49 }
 0x290   :  { %v526_v51 = vpop.f32.mrf.mxu0 }
 0x291   :  { %397 = vst [vmem:[%s728_s7 + $0x8] sm:$0xff] %v393_v50 }

</bundles_post_ra>
